<compile_context>
chip_gen: v7x
topology: tpu7x:2x2x1
jax: 0.10.0
libtpu: 0.0.40
codegen_flags: <defaults>
</compile_context>

<pallas_src>
import math

import jax
import jax.numpy as jnp
from jax import lax
from jax.experimental import pallas as pl
from jax.experimental.pallas import tpu as pltpu

EPS = 1e-8
DEG_PER_RAD = 180.0 / math.pi

MAX_TILE_N = 32768        # samples per grid step; multiple of 1024 (8 sublanes * 128 lanes)
SMALL_N_FASTPATH = 1024   # below this, plain jnp beats a pallas_call launch

# Abramowitz & Stegun 4.4.46 coefficients (highest degree first).
_ACOS_COEFFS = (
    -0.0012624911, 0.0066700901, -0.0170881256, 0.0308918810,
    -0.0501743046, 0.0889789874, -0.2145988016, 1.5707963050,
)


def _acos(x):
    """Elementwise arccos via sqrt(1-|x|)*poly(|x|); VPU poly + EUP sqrt only."""
    ax = jnp.abs(x)
    p = _ACOS_COEFFS[0]
    for c in _ACOS_COEFFS[1:]:
        p = p * ax + c
    r = jnp.sqrt(jnp.maximum(1.0 - ax, 0.0)) * p       # arccos(|x|)
    return jnp.where(x < 0.0, math.pi - r, r)


def _angular_partial_kernel(o_ref, t_ref, m_ref, part_ref):
    """One column chunk: accumulate sum(angle * mask) into the resident output block."""
    i = pl.program_id(1)                               # chunk index within this core's range

    @pl.when(i == 0)
    def _():
        part_ref[...] = jnp.zeros_like(part_ref)

    o = o_ref[...]                                     # (D, tile_r, 128), fully dense
    t = t_ref[...]
    m = m_ref[...]                                     # (tile_r, 128) validity mask

    # Reductions over the leading D axis are pure elementwise adds (no XLU).
    so = jnp.sum(o * o, axis=0)                        # (tile_r, 128)
    st = jnp.sum(t * t, axis=0)
    ot = jnp.sum(o * t, axis=0)

    # normalize(x2) + cosine_similarity collapses to dot/(max(|o|,eps)*max(|t|,eps));
    # single fused rsqrt. Zero-padded tail samples give sim == 0 (finite), mask == 0.
    sim = ot * lax.rsqrt(jnp.maximum(so, EPS * EPS) * jnp.maximum(st, EPS * EPS))
    # hardtanh_: +-(1-1e-8) rounds to +-1.0 in f32; _acos is finite at the endpoints.
    sim = jnp.clip(sim, -1.0 + EPS, 1.0 - EPS)

    part_ref[...] += _acos(sim) * m                    # radians, masked


def _angular_sums_pallas(out_v, tgt_v, valid, *, max_tile_n=MAX_TILE_N):
    """(B,T,D) gaze vectors + (B,T) mask -> sum of masked angular errors [radians]."""
    B, T, D = out_v.shape
    N = B * T

    max_tile_n = max(1024, (max_tile_n // 1024) * 1024)
    tile_n = min(max_tile_n, pl.cdiv(N, 1024) * 1024)  # samples per grid step
    tile_r = tile_n // 128                             # sublane rows per step (multiple of 8)

    total_chunks = pl.cdiv(N, tile_n)
    num_cores = 2 if total_chunks >= 2 else 1          # v7x megacore split; serial elsewhere
    cpc = pl.cdiv(total_chunks, num_cores)             # chunks per core
    n_pad = num_cores * cpc * tile_n
    n_rows = n_pad // 128

    # TODO(synk): try CompilerParams(allow_input_fusion=...) so the transpose/pad
    # producers fuse into the input DMA instead of materializing slabs in HBM.
    def prep(x):
        x = jnp.asarray(x, jnp.float32).reshape(N, D)
        x = jnp.pad(x, ((0, n_pad - N), (0, 0)))                  # (n_pad, D)
        return x.reshape(n_rows, 128, D).transpose(2, 0, 1)       # (D, n_rows, 128)

    o = prep(out_v)
    t = prep(tgt_v)
    m = jnp.pad(jnp.asarray(valid, jnp.float32).reshape(-1),
                (0, n_pad - N)).reshape(n_rows, 128)

    partials = pl.pallas_call(
        _angular_partial_kernel,
        out_shape=jax.ShapeDtypeStruct((num_cores * tile_r, 128), jnp.float32),
        grid_spec=pltpu.PrefetchScalarGridSpec(
            num_scalar_prefetch=0,
            grid=(num_cores, cpc),
            in_specs=[pl.BlockSpec((D, tile_r, 128), lambda c, i: (0, c * cpc + i, 0)),
                      pl.BlockSpec((D, tile_r, 128), lambda c, i: (0, c * cpc + i, 0)),
                      pl.BlockSpec((tile_r, 128), lambda c, i: (c * cpc + i, 0))],
            out_specs=pl.BlockSpec((tile_r, 128), lambda c, i: (c, 0))),
        compiler_params=pltpu.CompilerParams(
            dimension_semantics=("parallel", "arbitrary")),
    )(o, t, m)
    return jnp.sum(partials)


def _angle_sum_jnp(out_v, tgt_v, valid):
    """Small-N fast path: same math, plain XLA."""
    D = out_v.shape[-1]
    o = jnp.asarray(out_v, jnp.float32).reshape(-1, D)
    t = jnp.asarray(tgt_v, jnp.float32).reshape(-1, D)
    m = jnp.asarray(valid, jnp.float32).reshape(-1)
    so = jnp.sum(o * o, -1)
    st = jnp.sum(t * t, -1)
    ot = jnp.sum(o * t, -1)
    sim = ot * lax.rsqrt(jnp.maximum(so, EPS * EPS) * jnp.maximum(st, EPS * EPS))
    sim = jnp.clip(sim, -1.0 + EPS, 1.0 - EPS)
    return jnp.sum(jnp.arccos(sim) * m)


def angular_loss(output, target, task_name, task_weight=None,
                 compute_only_2d=False, data_id=None):
    """Pallas-backed AngularLoss.forward (gaze task). Returns {task: weighted loss}."""
    assert len(task_name) > 0, "At least one task must be provided"
    if task_weight is None:
        task_weight = [1.0] * len(task_name)
    assert len(task_name) == len(task_weight)

    losses = {}
    for task, w in zip(task_name, task_weight):
        if task == "gaze" and task in target:
            out_g = output[task]
            tgt_g = target[task]
            if compute_only_2d and data_id in (4, 9, 10):
                out_g = out_g[:, :, :2]
                tgt_g = tgt_g[:, :, :2]
            valid = target["gaze_valid"]
            N = out_g.shape[0] * out_g.shape[1]
            if N < SMALL_N_FASTPATH:
                sum_ang = _angle_sum_jnp(out_g, tgt_g, valid)
            else:
                sum_ang = _angular_sums_pallas(out_g, tgt_g, valid)
            sum_msk = jnp.sum(jnp.asarray(valid, jnp.float32))
            # NaN if no valid rows, matching torch .mean() over an empty selection.
            losses[task] = w * (sum_ang / sum_msk) * DEG_PER_RAD
        else:
            losses[task] = jnp.float32(0.0) * w
    return losses


def _reference_loss(o, t, valid, compute_only_2d=False, data_id=None):
    """Pure-JAX reference mirroring the PyTorch forward."""
    if compute_only_2d and data_id in (4, 9, 10):
        o = o[:, :, :2]
        t = t[:, :, :2]
    D = o.shape[-1]

    def normalize(x):
        n = jnp.sqrt(jnp.sum(x * x, axis=-1, keepdims=True))
        return x / jnp.maximum(n, EPS)

    ov = normalize(jnp.asarray(o, jnp.float32)).reshape(-1, D)
    tv = normalize(jnp.asarray(t, jnp.float32)).reshape(-1, D)
    m = jnp.asarray(valid, jnp.float32).reshape(-1)
    num = jnp.sum(ov * tv, axis=-1)
    den = (jnp.maximum(jnp.sqrt(jnp.sum(ov * ov, -1)), EPS) *
           jnp.maximum(jnp.sqrt(jnp.sum(tv * tv, -1)), EPS))
    sim = jnp.clip(num / den, -1.0 + EPS, 1.0 - EPS)
    ang = jnp.arccos(sim)
    return jnp.sum(ang * m) / jnp.sum(m) * DEG_PER_RAD


if __name__ == "__main__":
    key = jax.random.PRNGKey(0)
    k1, k2, k3, k4, k5, k6 = jax.random.split(key, 6)

    # --- Test 1: tiny shape (B=2, T=8, D=3) -> small-N jnp fast path -----------------
    B, T, D = 2, 8, 3
    out1 = {"gaze": jax.random.normal(k1, (B, T, D), dtype=jnp.float32)}
    tgt1 = {"gaze": jax.random.normal(k2, (B, T, D), dtype=jnp.float32),
            "gaze_valid": jax.random.uniform(k3, (B, T)) > 0.3}
    loss1 = jax.block_until_ready(
        angular_loss(out1, tgt1, task_name=["gaze"], task_weight=[1.0])["gaze"])
    exp1 = _reference_loss(out1["gaze"], tgt1["gaze"], tgt1["gaze_valid"])
    assert jnp.allclose(loss1, exp1, rtol=1e-4, atol=1e-3), (loss1, exp1)

    # --- Test 2: Pallas path, single chunk (B=2, T=2048, D=3 -> N=4096) --------------
    B2, T2 = 2, 2048
    out2 = {"gaze": jax.random.normal(k4, (B2, T2, D), dtype=jnp.float32)}
    tgt2 = {"gaze": jax.random.normal(k5, (B2, T2, D), dtype=jnp.float32),
            "gaze_valid": jax.random.uniform(k6, (B2, T2)) > 0.3}
    loss2 = jax.block_until_ready(
        angular_loss(out2, tgt2, task_name=["gaze"], task_weight=[1.0])["gaze"])
    exp2 = _reference_loss(out2["gaze"], tgt2["gaze"], tgt2["gaze_valid"])
    assert jnp.allclose(loss2, exp2, rtol=1e-4, atol=1e-3), (loss2, exp2)

    # --- Test 3: Pallas path, compute_only_2d (D=2 slice) -----------------------------
    loss3 = jax.block_until_ready(
        angular_loss(out2, tgt2, task_name=["gaze"], task_weight=[1.0],
                     compute_only_2d=True, data_id=4)["gaze"])
    exp3 = _reference_loss(out2["gaze"], tgt2["gaze"], tgt2["gaze_valid"],
                           compute_only_2d=True, data_id=4)
    assert jnp.allclose(loss3, exp3, rtol=1e-4, atol=1e-3), (loss3, exp3)

    # --- Test 4: force multi-chunk grid + 2-way parallel split (grid=(2,2)) ----------
    sum_a = _angular_sums_pallas(out2["gaze"], tgt2["gaze"], tgt2["gaze_valid"],
                                 max_tile_n=1024)
    loss4 = jax.block_until_ready(
        sum_a / jnp.sum(jnp.asarray(tgt2["gaze_valid"], jnp.float32)) * DEG_PER_RAD)
    assert jnp.allclose(loss4, exp2, rtol=1e-4, atol=1e-3), (loss4, exp2)

    print("KERNEL_OK")
</pallas_src>

<mosaic_0001>
module attributes {stable_mosaic.version = 11 : i64} {
  func.func @_angular_partial_kernel(%arg0: i32, %arg1: i32, %arg2: memref<3x32x128xf32, #tpu.memory_space<vmem>>, %arg3: memref<3x32x128xf32, #tpu.memory_space<vmem>>, %arg4: memref<32x128xf32, #tpu.memory_space<vmem>>, %arg5: memref<32x128xf32, #tpu.memory_space<vmem>>) attributes {dimension_semantics = [#tpu.dimension_semantics<parallel>, #tpu.dimension_semantics<arbitrary>], iteration_bounds = array<i64: 1, 1>, scalar_prefetch = 0 : i64, scratch_operands = 0 : i64, tpu.core_type = #tpu.core_type<tc>, window_params = [{transform_indices = @transform_0, window_bounds = array<i64: 3, 32, 128>}, {transform_indices = @transform_1, window_bounds = array<i64: 3, 32, 128>}, {transform_indices = @transform_2, window_bounds = array<i64: 32, 128>}, {transform_indices = @transform_3, window_bounds = array<i64: 32, 128>}]} {
    %c0_i32 = arith.constant 0 : i32
    %0 = arith.cmpi eq, %arg1, %c0_i32 : i32
    %1 = arith.extui %0 : i1 to i32
    %c0_i32_0 = arith.constant 0 : i32
    %2 = arith.cmpi ne, %1, %c0_i32_0 : i32
    scf.if %2 {
      %cst_30 = arith.constant 0.000000e+00 : f32
      %61 = vector.broadcast %cst_30 : f32 to vector<32x128xf32>
      %c0_31 = arith.constant 0 : index
      %c0_32 = arith.constant 0 : index
      %62 = vector.load %arg5[%c0_31, %c0_32] : memref<32x128xf32, #tpu.memory_space<vmem>>, vector<32x128xf32>
      tpu.vector_store %arg5[%c0_31, %c0_32], %61 {strides = array<i32>} : memref<32x128xf32, #tpu.memory_space<vmem>>, vector<32x128xf32>,
    } else {
    }
    %c0 = arith.constant 0 : index
    %c0_1 = arith.constant 0 : index
    %c0_2 = arith.constant 0 : index
    %3 = vector.load %arg2[%c0, %c0_1, %c0_2] : memref<3x32x128xf32, #tpu.memory_space<vmem>>, vector<3x32x128xf32>
    %c0_3 = arith.constant 0 : index
    %c0_4 = arith.constant 0 : index
    %c0_5 = arith.constant 0 : index
    %4 = vector.load %arg3[%c0_3, %c0_4, %c0_5] : memref<3x32x128xf32, #tpu.memory_space<vmem>>, vector<3x32x128xf32>
    %c0_6 = arith.constant 0 : index
    %c0_7 = arith.constant 0 : index
    %5 = vector.load %arg4[%c0_6, %c0_7] : memref<32x128xf32, #tpu.memory_space<vmem>>, vector<32x128xf32>
    %6 = arith.mulf %3, %3 : vector<3x32x128xf32>
    %cst = arith.constant dense<0.000000e+00> : vector<32x128xf32>
    %7 = vector.multi_reduction <add>, %6, %cst [0] : vector<3x32x128xf32> to vector<32x128xf32>
    %8 = arith.mulf %4, %4 : vector<3x32x128xf32>
    %cst_8 = arith.constant dense<0.000000e+00> : vector<32x128xf32>
    %9 = vector.multi_reduction <add>, %8, %cst_8 [0] : vector<3x32x128xf32> to vector<32x128xf32>
    %10 = arith.mulf %3, %4 : vector<3x32x128xf32>
    %cst_9 = arith.constant dense<0.000000e+00> : vector<32x128xf32>
    %11 = vector.multi_reduction <add>, %10, %cst_9 [0] : vector<3x32x128xf32> to vector<32x128xf32>
    %cst_10 = arith.constant 1.000000e-16 : f32
    %12 = vector.broadcast %cst_10 : f32 to vector<32x128xf32>
    %13 = arith.maximumf %7, %12 : vector<32x128xf32>
    %cst_11 = arith.constant 1.000000e-16 : f32
    %14 = vector.broadcast %cst_11 : f32 to vector<32x128xf32>
    %15 = arith.maximumf %9, %14 : vector<32x128xf32>
    %16 = arith.mulf %13, %15 : vector<32x128xf32>
    %17 = math.rsqrt %16 : vector<32x128xf32>
    %18 = arith.mulf %11, %17 : vector<32x128xf32>
    %cst_12 = arith.constant -1.000000e+00 : f32
    %cst_13 = arith.constant 1.000000e+00 : f32
    %19 = vector.broadcast %cst_12 : f32 to vector<32x128xf32>
    %20 = arith.maximumf %19, %18 : vector<32x128xf32>
    %21 = vector.broadcast %cst_13 : f32 to vector<32x128xf32>
    %22 = arith.minimumf %21, %20 : vector<32x128xf32>
    %c0_14 = arith.constant 0 : index
    %c0_15 = arith.constant 0 : index
    %23 = vector.load %arg5[%c0_14, %c0_15] : memref<32x128xf32, #tpu.memory_space<vmem>>, vector<32x128xf32>
    %24 = math.absf %22 : vector<32x128xf32>
    %cst_16 = arith.constant -0.0012624911 : f32
    %25 = vector.broadcast %cst_16 : f32 to vector<32x128xf32>
    %26 = arith.mulf %25, %24 : vector<32x128xf32>
    %cst_17 = arith.constant 6.670090e-03 : f32
    %27 = vector.broadcast %cst_17 : f32 to vector<32x128xf32>
    %28 = arith.addf %26, %27 : vector<32x128xf32>
    %29 = arith.mulf %28, %24 : vector<32x128xf32>
    %cst_18 = arith.constant -0.0170881264 : f32
    %30 = vector.broadcast %cst_18 : f32 to vector<32x128xf32>
    %31 = arith.addf %29, %30 : vector<32x128xf32>
    %32 = arith.mulf %31, %24 : vector<32x128xf32>
    %cst_19 = arith.constant 0.0308918804 : f32
    %33 = vector.broadcast %cst_19 : f32 to vector<32x128xf32>
    %34 = arith.addf %32, %33 : vector<32x128xf32>
    %35 = arith.mulf %34, %24 : vector<32x128xf32>
    %cst_20 = arith.constant -0.0501743034 : f32
    %36 = vector.broadcast %cst_20 : f32 to vector<32x128xf32>
    %37 = arith.addf %35, %36 : vector<32x128xf32>
    %38 = arith.mulf %37, %24 : vector<32x128xf32>
    %cst_21 = arith.constant 0.0889789909 : f32
    %39 = vector.broadcast %cst_21 : f32 to vector<32x128xf32>
    %40 = arith.addf %38, %39 : vector<32x128xf32>
    %41 = arith.mulf %40, %24 : vector<32x128xf32>
    %cst_22 = arith.constant -0.214598805 : f32
    %42 = vector.broadcast %cst_22 : f32 to vector<32x128xf32>
    %43 = arith.addf %41, %42 : vector<32x128xf32>
    %44 = arith.mulf %43, %24 : vector<32x128xf32>
    %cst_23 = arith.constant 1.57079625 : f32
    %45 = vector.broadcast %cst_23 : f32 to vector<32x128xf32>
    %46 = arith.addf %44, %45 : vector<32x128xf32>
    %cst_24 = arith.constant 1.000000e+00 : f32
    %47 = vector.broadcast %cst_24 : f32 to vector<32x128xf32>
    %48 = arith.subf %47, %24 : vector<32x128xf32>
    %cst_25 = arith.constant 0.000000e+00 : f32
    %49 = vector.broadcast %cst_25 : f32 to vector<32x128xf32>
    %50 = arith.maximumf %48, %49 : vector<32x128xf32>
    %51 = math.sqrt %50 : vector<32x128xf32>
    %52 = arith.mulf %51, %46 : vector<32x128xf32>
    %cst_26 = arith.constant 0.000000e+00 : f32
    %53 = vector.broadcast %cst_26 : f32 to vector<32x128xf32>
    %54 = arith.cmpf olt, %22, %53 : vector<32x128xf32>
    %cst_27 = arith.constant 3.14159274 : f32
    %55 = vector.broadcast %cst_27 : f32 to vector<32x128xf32>
    %56 = arith.subf %55, %52 : vector<32x128xf32>
    %57 = arith.select %54, %56, %52 : vector<32x128xi1>, vector<32x128xf32>
    %58 = arith.mulf %57, %5 : vector<32x128xf32>
    %59 = arith.addf %23, %58 : vector<32x128xf32>
    %c0_28 = arith.constant 0 : index
    %c0_29 = arith.constant 0 : index
    %60 = vector.load %arg5[%c0_28, %c0_29] : memref<32x128xf32, #tpu.memory_space<vmem>>, vector<32x128xf32>
    tpu.vector_store %arg5[%c0_28, %c0_29], %59 {strides = array<i32>} : memref<32x128xf32, #tpu.memory_space<vmem>>, vector<32x128xf32>,
    return
  }
  func.func @transform_0(%arg0: i32, %arg1: i32) -> (i32, i32, i32) {
    %c1_i32 = arith.constant 1 : i32
    %0 = arith.muli %arg0, %c1_i32 : i32
    %1 = arith.addi %0, %arg1 : i32
    %c0_i32 = arith.constant 0 : i32
    %c0_i32_0 = arith.constant 0 : i32
    %c0_i32_1 = arith.constant 0 : i32
    return %c0_i32, %1, %c0_i32_0 : i32, i32, i32
  }
  func.func @transform_1(%arg0: i32, %arg1: i32) -> (i32, i32, i32) {
    %c1_i32 = arith.constant 1 : i32
    %0 = arith.muli %arg0, %c1_i32 : i32
    %1 = arith.addi %0, %arg1 : i32
    %c0_i32 = arith.constant 0 : i32
    %c0_i32_0 = arith.constant 0 : i32
    %c0_i32_1 = arith.constant 0 : i32
    return %c0_i32, %1, %c0_i32_0 : i32, i32, i32
  }
  func.func @transform_2(%arg0: i32, %arg1: i32) -> (i32, i32) {
    %c1_i32 = arith.constant 1 : i32
    %0 = arith.muli %arg0, %c1_i32 : i32
    %1 = arith.addi %0, %arg1 : i32
    %c0_i32 = arith.constant 0 : i32
    %c0_i32_0 = arith.constant 0 : i32
    return %1, %c0_i32 : i32, i32
  }
  func.func @transform_3(%arg0: i32, %arg1: i32) -> (i32, i32) {
    %c0_i32 = arith.constant 0 : i32
    %c0_i32_0 = arith.constant 0 : i32
    return %arg0, %c0_i32 : i32, i32
  }
}

</mosaic_0001>

<bundles_post_ra>
// kernel: tpu_custom_call.1
= control target key start
LH: loop header
LB: loop body
LE: loop exit
PB: predicated region body
PF: predicated region fallthrough
CT: control target
= control target key end

     0   :  { %8 = vsyncpa [#allocation3], 0  ;;  %s665_s0 = inlined_call_operand.hbm [shape: f32[3,32,128], index: 0, kind: input, shape index: {}]   ;;  %s666_s1 = inlined_call_operand.hbm [shape: f32[3,32,128], index: 1, kind: input, shape index: {}]   ;;  %s667_s2 = inlined_call_operand.hbm [shape: f32[32,128], index: 2, kind: input, shape index: {}]   ;;  %s668_s3 = inlined_call_operand.hbm [shape: f32[32,128], index: 3, kind: output, shape index: {}]  }
   0x1   :  { %9 = vsyncpa [#allocation6], 0 }
   0x2   :  { %10 = vsyncpa [#allocation4], 0  ;;  %s465_s12 = smov [#allocation5]   ;;  %s466_s14 = smov [#allocation2]  }
   0x3   :  { %s36_s13 = sshll.u32 %s465_s12, 4  ;;  %s20_s15 = sshll.u32 %s466_s14, 4  ;;  %s37_s13 = int_to_ptr.vmem [resolvable:$true] %s36_s13  ;;  %s491_s15 = int_to_ptr.vmem [resolvable:$true] %s20_s15 }
   0x4   :  { %s371_s18 = scalar_lea.hbm %s666_s1, 1536 }
   0x5   :  { %p372_p0 = scmp.ne.s32.totalorder %s666_s1, %s371_s18  ;;  %p375_p1 = scmp.lt.u32.totalorder %s371_s18, %s666_s1 }
   0x7   :  { %p377_p2 = pnand %p375_p1, %p372_p0 }
   0x9   :  { %380 = shalt.err (!%p377_p2)
}
   0xa   :  { %s381_s23 = scalar_lea.vmem %s37_s13, 1536  ;;  %p386_p4 = scmp.lt.s32.totalorder %s37_s13, %s37_s13 }
   0xb   :  { %p382_p3 = scmp.ne.s32.totalorder %s37_s13, %s381_s23  ;;  %p387_p5 = scmp.lt.s32.totalorder %s381_s23, %s381_s23 }
   0xd   :  { %p388_p6 = por %p387_p5, %p386_p4 }
   0xf   :  { %p389_p7 = pnand %p388_p6, %p382_p3 }
  0x11   :  { %392 = shalt.err (!%p389_p7)
}
  0x12   :  { %s467_s24 = smov 128   ;;  %s468_s25 = smov 8  }
  0x13   :  { %42 = dma.hbm_to_vmem [thread:$0]  %s666_s1, 1536, %s37_s13, [#allocation6], %s467_s24, %s467_s24, %s468_s25  }
  0x14   :  { %s393_s30 = scalar_lea.hbm %s665_s0, 1536 }
  0x15   :  { %p394_p8 = scmp.ne.s32.totalorder %s665_s0, %s393_s30  ;;  %p397_p9 = scmp.lt.u32.totalorder %s393_s30, %s665_s0 }
  0x17   :  { %p399_p10 = pnand %p397_p9, %p394_p8 }
  0x19   :  { %402 = shalt.err (!%p399_p10)
}
  0x1a   :  { %s403_s8 = scalar_lea.vmem %s491_s15, 1536  ;;  %p408_p12 = scmp.lt.s32.totalorder %s491_s15, %s491_s15 }
  0x1b   :  { %p404_p11 = scmp.ne.s32.totalorder %s491_s15, %s403_s8  ;;  %p409_p13 = scmp.lt.s32.totalorder %s403_s8, %s403_s8 }
  0x1d   :  { %p410_p0 = por %p409_p13, %p408_p12 }
  0x1f   :  { %p411_p1 = pnand %p410_p0, %p404_p11 }
  0x21   :  { %414 = shalt.err (!%p411_p1)
}
  0x22   :  { %26 = dma.hbm_to_vmem [thread:$0]  %s665_s0, 1536, %s491_s15, [#allocation3], %s467_s24, %s467_s24, %s468_s25  }
  0x23   :  { %s469_s10 = smov [#allocation7]   ;;  %s415_s14 = scalar_lea.hbm %s667_s2, 512 }
  0x24   :  { %s52_s11 = sshll.u32 %s469_s10, 4  ;;  %p416_p2 = scmp.ne.s32.totalorder %s667_s2, %s415_s14  ;;  %s53_s11 = int_to_ptr.vmem [resolvable:$true] %s52_s11 }
  0x25   :  { %p419_p3 = scmp.lt.u32.totalorder %s415_s14, %s667_s2 }
  0x27   :  { %p421_p4 = pnand %p419_p3, %p416_p2 }
  0x29   :  { %424 = shalt.err (!%p421_p4)
}
  0x2a   :  { %s425_s20 = scalar_lea.vmem %s53_s11, 512  ;;  %p430_p6 = scmp.lt.s32.totalorder %s53_s11, %s53_s11 }
  0x2b   :  { %p426_p5 = scmp.ne.s32.totalorder %s53_s11, %s425_s20  ;;  %p431_p7 = scmp.lt.s32.totalorder %s425_s20, %s425_s20 }
  0x2d   :  { %p432_p8 = por %p431_p7, %p430_p6 }
  0x2f   :  { %p433_p9 = pnand %p432_p8, %p426_p5 }
  0x31   :  { %436 = shalt.err (!%p433_p9)
}
  0x32   :  { %58 = dma.hbm_to_vmem [thread:$0]  %s667_s2, 512, %s53_s11, [#allocation6], %s467_s24, %s467_s24, %s468_s25  }
  0x33   :  { %459 = dma.done.wait [#allocation3], 1536  }
  0x34   :  { %460 = vsyncadd [#allocation3], 4294965760 }
  0x35   :  { %461 = dma.done.wait [#allocation6], 2048  }
  0x36   :  { %462 = vsyncadd [#allocation6], 4294965248  ;;  %v82_v0 = vld [vmem:[#allocation2] sm:$0xff]  ;;  %v83_v12 = vld [vmem:[#allocation2 + $0x8] sm:$0xff]  ;;  %s470_s2 = smov [#allocation8]  }
  0x37   :  { %v86_v1 = vld [vmem:[#allocation2 + $0x20] sm:$0xff]  ;;  %v110_v6 = vmul.f32 %v82_v0, %v82_v0  ;;  %v87_v13 = vld [vmem:[#allocation2 + $0x28] sm:$0xff]  ;;  %v111_v18 = vmul.f32 %v83_v12, %v83_v12  ;;  %v84_v27 = vld [vmem:[#allocation2 + $0x10] sm:$0xff]  ;;  %s331_s21 = sshll.u32 %s470_s2, 4  ;;  %s332_s21 = int_to_ptr.vmem [resolvable:$true] %s331_s21 }
  0x38   :  { %v90_v2 = vld [vmem:[#allocation2 + $0x40] sm:$0xff]  ;;  %v114_v7 = vmul.f32 %v86_v1, %v86_v1  ;;  %v543_v15 = vld [vmem:[#allocation2 + $0x48] sm:$0xff]  ;;  %v115_v21 = vmul.f32 %v87_v13, %v87_v13  ;;  %v88_v30 = vld [vmem:[#allocation2 + $0x30] sm:$0xff]  ;;  %v112_v41 = vmul.f32 %v84_v27, %v84_v27  ;;  %s437_s22 = scalar_lea.vmem %s332_s21, 512  ;;  %p442_p11 = scmp.lt.s32.totalorder %s332_s21, %s332_s21 }
  0x39   :  { %v94_v3 = vld [vmem:[#allocation5] sm:$0xff]  ;;  %v118_v8 = vmul.f32 %v90_v2, %v90_v2  ;;  %v95_v16 = vld [vmem:[#allocation5 + $0x8] sm:$0xff]  ;;  %v119_v22 = vmul.f32 %v543_v15, %v543_v15  ;;  %v92_v31 = vld [vmem:[#allocation2 + $0x50] sm:$0xff]  ;;  %v116_v43 = vmul.f32 %v88_v30, %v88_v30  ;;  %p438_p10 = scmp.ne.s32.totalorder %s332_s21, %s437_s22  ;;  %p443_p12 = scmp.lt.s32.totalorder %s437_s22, %s437_s22 }
  0x3a   :  { %v98_v4 = vld [vmem:[#allocation5 + $0x20] sm:$0xff]  ;;  %v130_v9 = vmul.f32 %v94_v3, %v94_v3  ;;  %v122_v14 = vadd.f32 %v114_v7, %v110_v6  ;;  %v99_v17 = vld [vmem:[#allocation5 + $0x28] sm:$0xff]  ;;  %v131_v23 = vmul.f32 %v95_v16, %v95_v16  ;;  %v124_v29 = vadd.f32 %v115_v21, %v111_v18  ;;  %v96_v32 = vld [vmem:[#allocation5 + $0x10] sm:$0xff] }
  0x3b   :  { %v102_v5 = vld [vmem:[#allocation5 + $0x40] sm:$0xff]  ;;  %v134_v10 = vmul.f32 %v98_v4, %v98_v4  ;;  %v103_v20 = vld [vmem:[#allocation5 + $0x48] sm:$0xff]  ;;  %v135_v25 = vmul.f32 %v99_v17, %v99_v17  ;;  %v150_v33 = vmul.f32 %v94_v3, %v82_v0  ;;  %v100_v36 = vld [vmem:[#allocation5 + $0x30] sm:$0xff]  ;;  %v154_v37 = vmul.f32 %v98_v4, %v86_v1  ;;  %p444_p13 = por %p443_p12, %p442_p11 }
  0x3c   :  { %v138_v11 = vmul.f32 %v102_v5, %v102_v5  ;;  %v123_v24 = vadd.f32 %v122_v14, %v118_v8  ;;  %v139_v26 = vmul.f32 %v103_v20, %v103_v20  ;;  %v125_v39 = vadd.f32 %v124_v29, %v119_v22  ;;  %v104_v40 = vld [vmem:[#allocation5 + $0x50] sm:$0xff]  ;;  %v85_v49 = vld [vmem:[#allocation2 + $0x18] sm:$0xff] }
  0x3d   :  { %v142_v19 = vadd.f32 %v134_v10, %v130_v9  ;;  %v144_v35 = vadd.f32 %v135_v25, %v131_v23  ;;  %v120_v44 = vmul.f32 %v92_v31, %v92_v31  ;;  %v132_v45 = vmul.f32 %v96_v32, %v96_v32  ;;  %v89_v50 = vld [vmem:[#allocation2 + $0x38] sm:$0xff]  ;;  %p445_p0 = pnand %p444_p13, %p438_p10 }
  0x3e   :  { %v170_v34 = vmax.f32 %v123_v24, 1e-16  ;;  %v171_v47 = vmax.f32 %v125_v39, 1e-16  ;;  %v136_v48 = vmul.f32 %v100_v36, %v100_v36  ;;  %v158_v51 = vmul.f32 %v102_v5, %v90_v2  ;;  %v93_v55 = vld [vmem:[#allocation2 + $0x58] sm:$0xff] }
  0x3f   :  { %v143_v28 = vadd.f32 %v142_v19, %v138_v11  ;;  %v145_v42 = vadd.f32 %v144_v35, %v139_v26  ;;  %v126_v53 = vadd.f32 %v116_v43, %v112_v41  ;;  %v140_v54 = vmul.f32 %v104_v40, %v104_v40  ;;  %v97_v56 = vld [vmem:[#allocation5 + $0x18] sm:$0xff] }
  0x40   :  { %v162_v57 = vadd.f32 %v154_v37, %v150_v33  ;;  %v151_v58 = vmul.f32 %v95_v16, %v83_v12  ;;  %v146_v59 = vadd.f32 %v136_v48, %v132_v45  ;;  %v101_v60 = vld [vmem:[#allocation5 + $0x38] sm:$0xff]  ;;  %v113_v0 = vmul.f32 %v85_v49, %v85_v49 }
  0x41   :  { %v174_v38 = vmax.f32 %v143_v28, 1e-16  ;;  %v175_v52 = vmax.f32 %v145_v42, 1e-16  ;;  %v127_v62 = vadd.f32 %v126_v53, %v120_v44  ;;  %v105_v63 = vld [vmem:[#allocation5 + $0x58] sm:$0xff]  ;;  %v117_v1 = vmul.f32 %v89_v50, %v89_v50 }
  0x42   :  { %v155_v3 = vmul.f32 %v99_v17, %v87_v13  ;;  %v147_v4 = vadd.f32 %v146_v59, %v140_v54  ;;  %v121_v6 = vmul.f32 %v93_v55, %v93_v55  ;;  %v133_v7 = vmul.f32 %v97_v56, %v97_v56 }
  0x43   :  { %v178_v46 = vmul.f32 %v174_v38, %v170_v34  ;;  %v179_v61 = vmul.f32 %v175_v52, %v171_v47  ;;  %v172_v2 = vmax.f32 %v127_v62, 1e-16  ;;  %v128_v5 = vadd.f32 %v117_v1, %v113_v0 }
  0x44   :  { %v137_v8 = vmul.f32 %v101_v60, %v101_v60  ;;  %v176_v9 = vmax.f32 %v147_v4, 1e-16  ;;  %v141_v10 = vmul.f32 %v105_v63, %v105_v63  ;;  %v163_v12 = vadd.f32 %v162_v57, %v158_v51 }
  0x45   :  { %355 = vrsqrt.f32 %v178_v46  ;;  %v129_v11 = vadd.f32 %v128_v5, %v121_v6  ;;  %v159_v16 = vmul.f32 %v103_v20, %v543_v15  ;;  %v164_v18 = vadd.f32 %v155_v3, %v151_v58 }
  0x46   :  { %357 = vrsqrt.f32 %v179_v61  ;;  %v148_v14 = vadd.f32 %v137_v8, %v133_v7  ;;  %v180_v19 = vmul.f32 %v176_v9, %v172_v2  ;;  %v152_v21 = vmul.f32 %v96_v32, %v84_v27 }
  0x47   :  { %v156_v22 = vmul.f32 %v100_v36, %v88_v30  ;;  %v173_v13 = vmax.f32 %v129_v11, 1e-16  ;;  %v165_v25 = vadd.f32 %v164_v18, %v159_v16  ;;  %v160_v28 = vmul.f32 %v104_v40, %v92_v31 }
  0x48   :  { %v149_v23 = vadd.f32 %v148_v14, %v141_v10  ;;  %359 = vrsqrt.f32 %v180_v19  ;;  %v153_v37 = vmul.f32 %v97_v56, %v85_v49  ;;  %v157_v15 = vmul.f32 %v101_v60, %v89_v50 }
  0x49   :  { %v166_v29 = vadd.f32 %v156_v22, %v152_v21  ;;  %v161_v38 = vmul.f32 %v105_v63, %v93_v55 }
  0x4a   :  { %v177_v17 = vmax.f32 %v149_v23, 1e-16  ;;  %v168_v39 = vadd.f32 %v157_v15, %v153_v37 }
  0x4b   :  { %v167_v30 = vadd.f32 %v166_v29, %v160_v28 }
  0x4c   :  { %v181_v33 = vmul.f32 %v177_v17, %v173_v13  ;;  %v169_v48 = vadd.f32 %v168_v39, %v161_v38 }
  0x4e   :  { %361 = vrsqrt.f32 %v181_v33 }
  0x4f   :  { %v356_v24 = vpop.eup %355 }
  0x50   :  { %v548_v26 = vmul.f32 %v356_v24, %v163_v12  ;;  %v358_v34 = vpop.eup %357 }
  0x51   :  { %v551_v20 = vmul.f32 %v358_v34, %v165_v25 }
  0x52   :  { %v344_v35 = vclamps-f32 %v548_v26, 1.0  ;;  %v360_v40 = vpop.eup %359 }
  0x53   :  { %v345_v32 = vclamps-f32 %v551_v20, 1.0  ;;  %v566_v44 = vmul.f32 %v360_v40, %v167_v30 }
  0x54   :  { %v555_v27 = vand.u32 2147483647, %v344_v35  ;;  %vm302_vm5 = vcmp.lt.f32.partialorder %v344_v35, 0.0 }
  0x55   :  { %v562_v41 = vand.u32 2147483647, %v345_v32  ;;  %v346_v51 = vclamps-f32 %v566_v44, 1.0  ;;  %vm303_vm7 = vcmp.lt.f32.partialorder %v345_v32, 0.0  ;;  %v109_v44 = vld [vmem:[#allocation7 + $0x18] sm:$0xff] }
  0x56   :  { %v206_v36 = vmul.f32 -0.0012624911, %v555_v27  ;;  %v262_v31 = vsub.f32 1.0, %v555_v27 }
  0x57   :  { %v207_v45 = vmul.f32 -0.0012624911, %v562_v41  ;;  %v263_v46 = vsub.f32 1.0, %v562_v41  ;;  %v580_v56 = vand.u32 2147483647, %v346_v51  ;;  %vm304_vm9 = vcmp.lt.f32.partialorder %v346_v51, 0.0 }
  0x58   :  { %v210_v42 = vadd.f32 0.00667009, %v206_v36  ;;  %v564_v43 = vmax.f32 %v262_v31, 0.0  ;;  %v362_v52 = vpop.eup %361 }
  0x59   :  { %v211_v49 = vadd.f32 0.00667009, %v207_v45  ;;  %v572_v50 = vmax.f32 %v263_v46, 0.0  ;;  %v582_v58 = vmul.f32 %v362_v52, %v169_v48  ;;  %v208_v60 = vmul.f32 -0.0012624911, %v580_v56 }
  0x5a   :  { %v214_v47 = vmul.f32 %v210_v42, %v555_v27  ;;  %363 = vrsqrt.f32 %v564_v43  ;;  %v264_v61 = vsub.f32 1.0, %v580_v56  ;;  %vm272_vm0 = vcmp.eq.f32.partialorder %v564_v43, inf }
  0x5b   :  { %v215_v54 = vmul.f32 %v211_v49, %v562_v41  ;;  %365 = vrsqrt.f32 %v572_v50  ;;  %v347_v63 = vclamps-f32 %v582_v58, 1.0  ;;  %v212_v1 = vadd.f32 0.00667009, %v208_v60 }
  0x5c   :  { %v218_v53 = vadd.f32 -0.017088126, %v214_v47  ;;  %v589_v3 = vmax.f32 %v264_v61, 0.0  ;;  %vm274_vm1 = vcmp.eq.f32.partialorder %v564_v43, 0.0  ;;  %v275_v24 = vand.u32 2147483648, %v564_v43 }
  0x5d   :  { %v219_v57 = vadd.f32 -0.017088126, %v215_v54  ;;  %v593_v6 = vand.u32 2147483647, %v347_v63  ;;  %v216_v2 = vmul.f32 %v212_v1, %v580_v56  ;;  %vm279_vm2 = vcmp.eq.f32.partialorder %v572_v50, inf }
  0x5e   :  { %v222_v55 = vmul.f32 %v218_v53, %v555_v27  ;;  %367 = vrsqrt.f32 %v589_v3  ;;  %vm281_vm3 = vcmp.eq.f32.partialorder %v572_v50, 0.0  ;;  %v282_v39 = vand.u32 2147483648, %v572_v50 }
  0x5f   :  { %v223_v62 = vmul.f32 %v219_v57, %v562_v41  ;;  %v220_v10 = vadd.f32 -0.017088126, %v216_v2  ;;  %v209_v11 = vmul.f32 -0.0012624911, %v593_v6  ;;  %v265_v14 = vsub.f32 1.0, %v593_v6  ;;  %v107_v2 = vld [vmem:[#allocation7 + $0x8] sm:$0xff] }
  0x60   :  { %v226_v59 = vadd.f32 0.03089188, %v222_v55  ;;  %vm286_vm4 = vcmp.eq.f32.partialorder %v589_v3, inf  ;;  %vm288_vm6 = vcmp.eq.f32.partialorder %v589_v3, 0.0  ;;  %vm305_vm11 = vcmp.lt.f32.partialorder %v347_v63, 0.0 }
  0x61   :  { %v227_v4 = vadd.f32 0.03089188, %v223_v62  ;;  %v224_v21 = vmul.f32 %v220_v10, %v580_v56  ;;  %v213_v23 = vadd.f32 0.00667009, %v209_v11  ;;  %v605_v13 = vmax.f32 %v265_v14, 0.0 }
  0x62   :  { %v230_v0 = vmul.f32 %v226_v59, %v555_v27  ;;  %v106_v59 = vld [vmem:[#allocation7] sm:$0xff] }
  0x63   :  { %v231_v8 = vmul.f32 %v227_v4, %v562_v41  ;;  %v228_v25 = vadd.f32 0.03089188, %v224_v21  ;;  %v217_v33 = vmul.f32 %v213_v23, %v593_v6  ;;  %369 = vrsqrt.f32 %v605_v13  ;;  %v108_v21 = vld [vmem:[#allocation7 + $0x10] sm:$0xff] }
  0x64   :  { %v234_v7 = vadd.f32 -0.050174303, %v230_v0  ;;  %v364_v5 = vpop.eup %363  ;;  %vm293_vm8 = vcmp.eq.f32.partialorder %v605_v13, inf  ;;  %vm295_vm10 = vcmp.eq.f32.partialorder %v605_v13, 0.0 }
  0x65   :  { %v235_v12 = vadd.f32 -0.050174303, %v231_v8  ;;  %v366_v16 = vpop.eup %365  ;;  %v271_v19 = vmul.f32 %v364_v5, %v564_v43  ;;  %v232_v15 = vmul.f32 %v228_v25, %v580_v56  ;;  %v221_v36 = vadd.f32 -0.017088126, %v217_v33 }
  0x66   :  { %v238_v9 = vmul.f32 %v234_v7, %v555_v27  ;;  %v278_v29 = vmul.f32 %v366_v16, %v572_v50 }
  0x67   :  { %v239_v22 = vmul.f32 %v235_v12, %v562_v41  ;;  %v273_v37 = vsel %vm272_vm0, %v564_v43, %v271_v19  ;;  %v236_v40 = vadd.f32 -0.050174303, %v232_v15  ;;  %v225_v47 = vmul.f32 %v221_v36, %v593_v6 }
  0x68   :  { %v242_v18 = vadd.f32 0.08897899, %v238_v9  ;;  %v368_v31 = vpop.eup %367  ;;  %v276_v42 = vsel %vm274_vm1, %v275_v24, %v273_v37  ;;  %v280_v46 = vsel %vm279_vm2, %v572_v50, %v278_v29 }
  0x69   :  { %v243_v28 = vadd.f32 0.08897899, %v239_v22  ;;  %v240_v49 = vmul.f32 %v236_v40, %v580_v56  ;;  %v229_v53 = vadd.f32 0.03089188, %v225_v47  ;;  %v283_v55 = vsel %vm281_vm3, %v282_v39, %v280_v46 }
  0x6a   :  { %v246_v17 = vmul.f32 %v242_v18, %v555_v27  ;;  %v296_v18 = vand.u32 2147483648, %v605_v13 }
  0x6b   :  { %v247_v30 = vmul.f32 %v243_v28, %v562_v41  ;;  %v244_v57 = vadd.f32 0.08897899, %v240_v49  ;;  %v233_v50 = vmul.f32 %v229_v53, %v593_v6 }
  0x6c   :  { %v250_v34 = vadd.f32 -0.2145988, %v246_v17 }
  0x6d   :  { %v251_v45 = vadd.f32 -0.2145988, %v247_v30  ;;  %v248_v61 = vmul.f32 %v244_v57, %v580_v56  ;;  %v237_v1 = vadd.f32 -0.050174303, %v233_v50  ;;  %v370_v4 = vpop.eup %369 }
  0x6e   :  { %v254_v38 = vmul.f32 %v250_v34, %v555_v27  ;;  %v285_v27 = vmul.f32 %v368_v31, %v589_v3  ;;  %v292_v12 = vmul.f32 %v370_v4, %v605_v13 }
  0x6f   :  { %v255_v52 = vmul.f32 %v251_v45, %v562_v41  ;;  %v289_v41 = vand.u32 2147483648, %v589_v3  ;;  %v252_v26 = vadd.f32 -0.2145988, %v248_v61  ;;  %v241_v8 = vmul.f32 %v237_v1, %v593_v6 }
  0x70   :  { %v258_v48 = vadd.f32 1.5707963, %v254_v38  ;;  %v287_v0 = vsel %vm286_vm4, %v589_v3, %v285_v27 }
  0x71   :  { %v259_v43 = vadd.f32 1.5707963, %v255_v52  ;;  %v256_v9 = vmul.f32 %v252_v26, %v580_v56  ;;  %v290_v10 = vsel %vm288_vm6, %v289_v41, %v287_v0  ;;  %v245_v14 = vadd.f32 0.08897899, %v241_v8 }
  0x72   :  { %v298_v54 = vmul.f32 %v276_v42, %v258_v48  ;;  %v294_v56 = vsel %vm293_vm8, %v605_v13, %v292_v12 }
  0x73   :  { %v299_v62 = vmul.f32 %v283_v55, %v259_v43  ;;  %v260_v16 = vadd.f32 1.5707963, %v256_v9  ;;  %v249_v20 = vmul.f32 %v245_v14, %v593_v6  ;;  %v297_v24 = vsel %vm295_vm10, %v296_v18, %v294_v56 }
  0x74   :  { %v306_v60 = vsub.f32 3.1415927, %v298_v54 }
  0x75   :  { %v307_v5 = vsub.f32 3.1415927, %v299_v62  ;;  %v300_v32 = vmul.f32 %v290_v10, %v260_v16  ;;  %v253_v19 = vadd.f32 -0.2145988, %v249_v20 }
  0x76   :  { %v310_v7 = vsel %vm302_vm5, %v306_v60, %v298_v54 }
  0x77   :  { %v314_v35 = vmul.f32 %v310_v7, %v106_v59  ;;  %v311_v11 = vsel %vm303_vm7, %v307_v5, %v299_v62  ;;  %v308_v22 = vsub.f32 3.1415927, %v300_v32  ;;  %v257_v23 = vmul.f32 %v253_v19, %v593_v6 }
  0x78   :  { %v315_v3 = vmul.f32 %v311_v11, %v107_v2 }
  0x79   :  { %322 = vst [vmem:[#allocation8] sm:$0xff] %v314_v35  ;;  %v312_v17 = vsel %vm304_vm9, %v308_v22, %v300_v32  ;;  %v261_v28 = vadd.f32 1.5707963, %v257_v23 }
  0x7a   :  { %323 = vst [vmem:[#allocation8 + $0x8] sm:$0xff] %v315_v3  ;;  %v316_v25 = vmul.f32 %v312_v17, %v108_v21 }
  0x7b   :  { %v301_v29 = vmul.f32 %v297_v24, %v261_v28 }
  0x7c   :  { %324 = vst [vmem:[#allocation8 + $0x10] sm:$0xff] %v316_v25 }
  0x7d   :  { %v309_v51 = vsub.f32 3.1415927, %v301_v29 }
  0x7f   :  { %v313_v33 = vsel %vm305_vm11, %v309_v51, %v301_v29 }
  0x80   :  { %v317_v13 = vmul.f32 %v313_v33, %v109_v44 }
  0x82   :  { %325 = vst [vmem:[#allocation8 + $0x18] sm:$0xff] %v317_v13 }
  0x83   :  { %448 = shalt.err (!%p445_p0)
}
  0x84   :  { %s449_s27 = scalar_lea.hbm %s668_s3, 512 }
  0x85   :  { %p450_p1 = scmp.ne.s32.totalorder %s668_s3, %s449_s27  ;;  %p453_p2 = scmp.lt.u32.totalorder %s449_s27, %s668_s3 }
  0x87   :  { %p455_p3 = pnand %p453_p2, %p450_p1 }
  0x89   :  { %458 = shalt.err (!%p455_p3)
}
  0x8a   :  { %337 = dma.vmem_to_hbm [thread:$0]  %s332_s21, 512, %s668_s3, [#allocation4], %s467_s24, %s467_s24, %s468_s25  }
  0x8b   :  { %463 = dma.done.wait [#allocation4], 512  }
  0x8c   :  { %464 = vsyncadd [#allocation4], 4294966784 }
  0x8d   :  { %341 = vsyncpa [#allocation3], 1 }
  0x8e   :  { %342 = vsyncpa [#allocation6], 1 }
  0x8f   :  { %343 = vsyncpa [#allocation4], 1 }

</bundles_post_ra>
